<compile_context>
chip_gen: v7x
topology: tpu7x:2x2x1
jax: 0.10.0
libtpu: 0.0.40
codegen_flags: <defaults>
</compile_context>

<pallas_src>
import functools
import math

import jax
import jax.numpy as jnp
from jax.experimental import pallas as pl
from jax.experimental.pallas import tpu as pltpu


_WORKSET_BYTES = 24 * 1024 * 1024    # budget: DMA buffers + in-kernel f32 temps
_VMEM_LIMIT = 40 * 1024 * 1024       # scoped VMEM limit (safe on v5e/v6e/v7x)
_MIN_SPLIT_TILE_BYTES = 512 * 1024   # don't shrink tiles below this just to add steps


def _round_up(a, b):
    return ((a + b - 1) // b) * b


def _max_tile_elems(itemsize):
    # Per tile element: 2x double-buffered input + 2x double-buffered output in
    # the input dtype, plus ~3 float32-sized temporaries inside the kernel body.
    per_elem = 4 * itemsize + 3 * 4
    return max(8 * 128, _WORKSET_BYTES // per_elem)


def _largest_divisor_leq(n, cap, multiple_of=1):
    """Largest d <= cap with d % multiple_of == 0 and n % d == 0, else 0."""
    cap = min(n, cap)
    d = (cap // multiple_of) * multiple_of
    while d >= multiple_of:
        if n % d == 0:
            return d
        d -= multiple_of
    return 0


# ---------------------------------------------------------------------------
# channels_first kernel: normalize over the channel axis of an NCHW tensor
# ---------------------------------------------------------------------------
def _ln_cf_kernel(x_ref, w_ref, b_ref, o_ref, *, eps, inv_c):
    # x_ref: (Nb, C, T)   w_ref/b_ref: (C, 1)
    x = x_ref[...].astype(jnp.float32)
    # Single-pass statistics: one read of x for both sums (fewer VALU passes
    # and one fewer full-size f32 temp than the mean->subtract->square form).
    u = jnp.sum(x, axis=1, keepdims=True) * inv_c                # (Nb, 1, T)
    m2 = jnp.sum(x * x, axis=1, keepdims=True) * inv_c
    var = jnp.maximum(m2 - u * u, 0.0)                           # clamp cancellation
    inv = jax.lax.rsqrt(var + eps)
    w = w_ref[...].astype(jnp.float32)[None, :, :]               # (1, C, 1)
    b = b_ref[...].astype(jnp.float32)[None, :, :]
    o_ref[...] = ((x - u) * inv * w + b).astype(o_ref.dtype)


def layer_norm_channels_first(x, weight, bias, eps=1e-6, *, max_tile_elems=None):
    """x: (N, C, H, W); weight/bias: (C,). Returns same shape/dtype as x."""
    N, C, H, W = x.shape
    HW = H * W
    itemsize = jnp.dtype(x.dtype).itemsize
    budget = max_tile_elems if max_tile_elems is not None else _max_tile_elems(itemsize)

    x2 = x.reshape(N, C, HW)          # free reshape (contiguous)
    w2 = weight.reshape(C, 1)
    b2 = bias.reshape(C, 1)

    img_elems = C * HW
    if img_elems <= budget:
        # Whole image(s) per grid step.  Last block dim = HW exactly (full
        # extent -> no lane padding, masked vst is fine since HBM bound).
        # Fold several images per step to amortize per-step overhead, but keep
        # >= ~8 steps and pick Nb as a divisor of N so tiling is exact.
        # Note: for C < 8 the (Nb, C, T) block under-fills vreg sublanes;
        # acceptable here because the op is HBM-bandwidth-bound.
        T = HW
        nt_hw = 1
        nb_cap = min(max(1, budget // img_elems), pl.cdiv(N, 8))
        Nb = _largest_divisor_leq(N, nb_cap) or 1
    else:
        # Image too large for one tile: split the spatial axis into 128-aligned
        # lane-dense tiles.  Prefer a tile that divides HW exactly; otherwise
        # use a ragged final block (the reduction is over C, always full
        # extent, so ragged columns never touch valid outputs).
        Nb = 1
        t_cap = max(128, (budget // C) // 128 * 128)
        if HW % 128 == 0:
            T = _largest_divisor_leq(HW // 128, t_cap // 128) * 128
            if T < t_cap // 2:
                T = t_cap                          # ragged final block
        else:
            T = min(t_cap, (HW // 128) * 128)      # ragged final block
            if T == 0:
                T = HW                             # tiny HW, huge C: full extent
        nt_hw = pl.cdiv(HW, T)

    grid = (pl.cdiv(N, Nb), nt_hw)

    out = pl.pallas_call(
        functools.partial(_ln_cf_kernel, eps=eps, inv_c=1.0 / C),
        out_shape=jax.ShapeDtypeStruct((N, C, HW), x.dtype),
        grid_spec=pltpu.PrefetchScalarGridSpec(
            num_scalar_prefetch=0,
            grid=grid,
            in_specs=[
                pl.BlockSpec((Nb, C, T), lambda n, j: (n, 0, j)),
                pl.BlockSpec((C, 1), lambda n, j: (0, 0)),
                pl.BlockSpec((C, 1), lambda n, j: (0, 0)),
            ],
            out_specs=pl.BlockSpec((Nb, C, T), lambda n, j: (n, 0, j)),
        ),
        compiler_params=pltpu.CompilerParams(
            dimension_semantics=("parallel", "parallel"),
            vmem_limit_bytes=_VMEM_LIMIT),
    )(x2, w2, b2)

    return out.reshape(N, C, H, W)


# ---------------------------------------------------------------------------
# channels_last kernel: standard layer_norm over the last dim of NHWC
# ---------------------------------------------------------------------------
def _ln_cl_kernel(x_ref, w_ref, b_ref, o_ref, *, eps, inv_c):
    # x_ref: (TR, C)   w_ref/b_ref: (1, C).  C block is always full extent, so
    # no masking of the statistics is needed.
    x = x_ref[...].astype(jnp.float32)
    u = jnp.sum(x, axis=-1, keepdims=True) * inv_c               # (TR, 1)
    m2 = jnp.sum(x * x, axis=-1, keepdims=True) * inv_c
    var = jnp.maximum(m2 - u * u, 0.0)
    inv = jax.lax.rsqrt(var + eps)
    w = w_ref[...].astype(jnp.float32)
    b = b_ref[...].astype(jnp.float32)
    o_ref[...] = ((x - u) * inv * w + b).astype(o_ref.dtype)


def layer_norm_channels_last(x, weight, bias, eps=1e-6, *, max_tile_elems=None):
    """x: (..., C); weight/bias: (C,). Returns same shape/dtype as x."""
    C = x.shape[-1]
    lead = x.shape[:-1]
    R = math.prod(lead) if lead else 1
    itemsize = jnp.dtype(x.dtype).itemsize
    budget = max_tile_elems if max_tile_elems is not None else _max_tile_elems(itemsize)

    x2 = x.reshape(R, C)              # free reshape
    w2 = weight.reshape(1, C)
    b2 = bias.reshape(1, C)

    # Row tile: as many rows as the VMEM budget allows (multiple of 8), but aim
    # for >= ~8 grid steps on large inputs (v7x has two TensorCores) without
    # shrinking tiles below ~512 KiB.  Prefer row tiles that divide R exactly;
    # otherwise let Pallas mask the ragged final block (rows are independent).
    tr_cap = max(8, (budget // max(C, 1)) // 8 * 8)
    rows_min_tile = max(8, (_MIN_SPLIT_TILE_BYTES // max(C * itemsize, 1)) // 8 * 8)
    tr_target = min(tr_cap, max(rows_min_tile, _round_up(pl.cdiv(R, 8), 8)))

    if R <= tr_target:
        TR = R                                    # single full-extent block
    else:
        d = _largest_divisor_leq(R, tr_target, multiple_of=8)
        TR = d if d >= max(8, tr_target // 2) else tr_target   # exact vs ragged tail
    nt = pl.cdiv(R, TR)

    out = pl.pallas_call(
        functools.partial(_ln_cl_kernel, eps=eps, inv_c=1.0 / C),
        out_shape=jax.ShapeDtypeStruct((R, C), x.dtype),
        grid_spec=pltpu.PrefetchScalarGridSpec(
            num_scalar_prefetch=0,
            grid=(nt,),
            in_specs=[
                pl.BlockSpec((TR, C), lambda i: (i, 0)),
                pl.BlockSpec((1, C), lambda i: (0, 0)),
                pl.BlockSpec((1, C), lambda i: (0, 0)),
            ],
            out_specs=pl.BlockSpec((TR, C), lambda i: (i, 0)),
        ),
        compiler_params=pltpu.CompilerParams(
            dimension_semantics=("parallel",),
            vmem_limit_bytes=_VMEM_LIMIT),
    )(x2, w2, b2)

    return out.reshape(*lead, C)


# ---------------------------------------------------------------------------
# pure-JAX references (mirror the PyTorch module exactly)
# ---------------------------------------------------------------------------
def _ref_channels_first(x, w, b, eps):
    x = x.astype(jnp.float32)
    u = jnp.mean(x, axis=1, keepdims=True)
    s = jnp.mean((x - u) ** 2, axis=1, keepdims=True)
    xn = (x - u) / jnp.sqrt(s + eps)
    return w[None, :, None, None] * xn + b[None, :, None, None]


def _ref_channels_last(x, w, b, eps):
    x = x.astype(jnp.float32)
    u = jnp.mean(x, axis=-1, keepdims=True)
    s = jnp.mean((x - u) ** 2, axis=-1, keepdims=True)
    xn = (x - u) / jnp.sqrt(s + eps)
    return w * xn + b


if __name__ == "__main__":
    key = jax.random.PRNGKey(0)
    k1, k2, k3 = jax.random.split(key, 3)
    eps = 1e-6

    def check(got, want, name, atol=2e-5, rtol=2e-5):
        got = jax.block_until_ready(got)
        assert jnp.allclose(jnp.asarray(got, jnp.float32), want,
                            atol=atol, rtol=rtol), name

    # ---- case 1: module-default small shapes --------------------------------
    N, C, H, W = 2, 4, 16, 16
    w4 = jnp.ones((C,), jnp.float32) + 0.1 * jax.random.normal(k2, (C,), jnp.float32)
    b4 = 0.05 * jnp.arange(C, dtype=jnp.float32)
    x_cf = jax.random.normal(k1, (N, C, H, W), jnp.float32)
    check(layer_norm_channels_first(x_cf, w4, b4, eps),
          _ref_channels_first(x_cf, w4, b4, eps), "cf small")
    x_cl = jnp.transpose(x_cf, (0, 2, 3, 1))
    check(layer_norm_channels_last(x_cl, w4, b4, eps),
          _ref_channels_last(x_cl, w4, b4, eps), "cl small")

    # ---- case 2: ConvNeXt-like ragged shapes (C=96, 7x7) — no padding needed --
    N2, C2, H2, W2 = 2, 96, 7, 7
    w96 = jnp.ones((C2,), jnp.float32) + 0.1 * jax.random.normal(k3, (C2,), jnp.float32)
    b96 = 0.01 * jnp.arange(C2, dtype=jnp.float32)
    x2_cf = jax.random.normal(k1, (N2, C2, H2, W2), jnp.float32)
    check(layer_norm_channels_first(x2_cf, w96, b96, eps),
          _ref_channels_first(x2_cf, w96, b96, eps), "cf 96x7x7")
    x2_cl = jnp.transpose(x2_cf, (0, 2, 3, 1))
    check(layer_norm_channels_last(x2_cl, w96, b96, eps),
          _ref_channels_last(x2_cl, w96, b96, eps), "cl 96x7x7")

    # ---- case 3: force multi-tile grids with ragged final blocks -------------
    # (exercises the in-kernel tail handling that replaced wrapper-side padding)
    N3, C3, H3, W3 = 2, 16, 23, 23           # HW = 529, R = 1058: no clean tiling
    w16 = jnp.ones((C3,), jnp.float32)
    b16 = 0.02 * jnp.arange(C3, dtype=jnp.float32)
    x3_cf = jax.random.normal(k1, (N3, C3, H3, W3), jnp.float32)
    check(layer_norm_channels_first(x3_cf, w16, b16, eps, max_tile_elems=16 * 256),
          _ref_channels_first(x3_cf, w16, b16, eps), "cf ragged tiles")
    x3_cl = jnp.transpose(x3_cf, (0, 2, 3, 1))
    check(layer_norm_channels_last(x3_cl, w16, b16, eps, max_tile_elems=16 * 160),
          _ref_channels_last(x3_cl, w16, b16, eps), "cl ragged tiles")

    # ---- case 4: bf16 input (exercises f32-working-set tile budgeting) -------
    x4 = jax.random.normal(k1, (2, 96, 14, 14), jnp.float32).astype(jnp.bfloat16)
    y4 = layer_norm_channels_first(x4, w96, b96, eps)
    assert y4.dtype == jnp.bfloat16
    check(y4, _ref_channels_first(x4.astype(jnp.float32), w96, b96, eps),
          "cf bf16", atol=3e-2, rtol=3e-2)

    print("KERNEL_OK")
</pallas_src>

<mosaic_0001>
module attributes {stable_mosaic.version = 11 : i64} {
  func.func @_ln_cf_kernel(%arg0: i32, %arg1: i32, %arg2: memref<1x4x256xf32, #tpu.memory_space<vmem>>, %arg3: memref<4x1xf32, #tpu.memory_space<vmem>>, %arg4: memref<4x1xf32, #tpu.memory_space<vmem>>, %arg5: memref<1x4x256xf32, #tpu.memory_space<vmem>>) attributes {dimension_semantics = [#tpu.dimension_semantics<parallel>, #tpu.dimension_semantics<parallel>], iteration_bounds = array<i64: 2, 1>, scalar_prefetch = 0 : i64, scratch_operands = 0 : i64, tpu.core_type = #tpu.core_type<tc>, window_params = [{transform_indices = @transform_0, window_bounds = array<i64: 1, 4, 256>}, {pipeline_mode = #tpu.pipeline_mode<synchronous>, transform_indices = @transform_1, window_bounds = array<i64: 4, 1>}, {pipeline_mode = #tpu.pipeline_mode<synchronous>, transform_indices = @transform_2, window_bounds = array<i64: 4, 1>}, {transform_indices = @transform_3, window_bounds = array<i64: 1, 4, 256>}]} {
    %c0 = arith.constant 0 : index
    %c0_0 = arith.constant 0 : index
    %c0_1 = arith.constant 0 : index
    %0 = vector.load %arg2[%c0, %c0_0, %c0_1] : memref<1x4x256xf32, #tpu.memory_space<vmem>>, vector<1x4x256xf32>
    %cst = arith.constant dense<0.000000e+00> : vector<1x256xf32>
    %1 = vector.multi_reduction <add>, %0, %cst [1] : vector<1x4x256xf32> to vector<1x256xf32>
    %2 = vector.shape_cast %1 : vector<1x256xf32> to vector<1x1x256xf32>
    %cst_2 = arith.constant 2.500000e-01 : f32
    %3 = vector.broadcast %cst_2 : f32 to vector<1x1x256xf32>
    %4 = arith.mulf %2, %3 : vector<1x1x256xf32>
    %5 = arith.mulf %0, %0 : vector<1x4x256xf32>
    %cst_3 = arith.constant dense<0.000000e+00> : vector<1x256xf32>
    %6 = vector.multi_reduction <add>, %5, %cst_3 [1] : vector<1x4x256xf32> to vector<1x256xf32>
    %7 = vector.shape_cast %6 : vector<1x256xf32> to vector<1x1x256xf32>
    %cst_4 = arith.constant 2.500000e-01 : f32
    %8 = vector.broadcast %cst_4 : f32 to vector<1x1x256xf32>
    %9 = arith.mulf %7, %8 : vector<1x1x256xf32>
    %10 = arith.mulf %4, %4 : vector<1x1x256xf32>
    %11 = arith.subf %9, %10 : vector<1x1x256xf32>
    %cst_5 = arith.constant 0.000000e+00 : f32
    %12 = vector.broadcast %cst_5 : f32 to vector<1x1x256xf32>
    %13 = arith.maximumf %11, %12 : vector<1x1x256xf32>
    %cst_6 = arith.constant 9.99999997E-7 : f32
    %14 = vector.broadcast %cst_6 : f32 to vector<1x1x256xf32>
    %15 = arith.addf %13, %14 : vector<1x1x256xf32>
    %16 = math.rsqrt %15 : vector<1x1x256xf32>
    %c0_7 = arith.constant 0 : index
    %c0_8 = arith.constant 0 : index
    %17 = vector.load %arg3[%c0_7, %c0_8] : memref<4x1xf32, #tpu.memory_space<vmem>>, vector<4x1xf32>
    %18 = vector.shape_cast %17 : vector<4x1xf32> to vector<1x4x1xf32>
    %c0_9 = arith.constant 0 : index
    %c0_10 = arith.constant 0 : index
    %19 = vector.load %arg4[%c0_9, %c0_10] : memref<4x1xf32, #tpu.memory_space<vmem>>, vector<4x1xf32>
    %20 = vector.shape_cast %19 : vector<4x1xf32> to vector<1x4x1xf32>
    %21 = vector.broadcast %4 : vector<1x1x256xf32> to vector<1x4x256xf32>
    %22 = arith.subf %0, %21 : vector<1x4x256xf32>
    %23 = vector.broadcast %16 : vector<1x1x256xf32> to vector<1x4x256xf32>
    %24 = arith.mulf %22, %23 : vector<1x4x256xf32>
    %25 = vector.broadcast %18 : vector<1x4x1xf32> to vector<1x4x256xf32>
    %26 = arith.mulf %24, %25 : vector<1x4x256xf32>
    %27 = vector.broadcast %20 : vector<1x4x1xf32> to vector<1x4x256xf32>
    %28 = arith.addf %26, %27 : vector<1x4x256xf32>
    %c0_11 = arith.constant 0 : index
    %c0_12 = arith.constant 0 : index
    %c0_13 = arith.constant 0 : index
    %29 = vector.load %arg5[%c0_11, %c0_12, %c0_13] : memref<1x4x256xf32, #tpu.memory_space<vmem>>, vector<1x4x256xf32>
    tpu.vector_store %arg5[%c0_11, %c0_12, %c0_13], %28 {strides = array<i32>} : memref<1x4x256xf32, #tpu.memory_space<vmem>>, vector<1x4x256xf32>,
    return
  }
  func.func @transform_0(%arg0: i32, %arg1: i32) -> (i32, i32, i32) {
    %c0_i32 = arith.constant 0 : i32
    %c0_i32_0 = arith.constant 0 : i32
    return %arg0, %c0_i32, %arg1 : i32, i32, i32
  }
  func.func @transform_1(%arg0: i32, %arg1: i32) -> (i32, i32) {
    %c0_i32 = arith.constant 0 : i32
    %c0_i32_0 = arith.constant 0 : i32
    %c0_i32_1 = arith.constant 0 : i32
    return %c0_i32, %c0_i32_0 : i32, i32
  }
  func.func @transform_2(%arg0: i32, %arg1: i32) -> (i32, i32) {
    %c0_i32 = arith.constant 0 : i32
    %c0_i32_0 = arith.constant 0 : i32
    %c0_i32_1 = arith.constant 0 : i32
    return %c0_i32, %c0_i32_0 : i32, i32
  }
  func.func @transform_3(%arg0: i32, %arg1: i32) -> (i32, i32, i32) {
    %c0_i32 = arith.constant 0 : i32
    %c0_i32_0 = arith.constant 0 : i32
    return %arg0, %c0_i32, %arg1 : i32, i32, i32
  }
}

</mosaic_0001>

<bundles_post_ra>
// kernel: tpu_custom_call.1
= control target key start
LH: loop header
LB: loop body
LE: loop exit
PB: predicated region body
PF: predicated region fallthrough
CT: control target
= control target key end

     0   :  { %8 = vsyncpa [#allocation3], 0  ;;  %s805_s0 = inlined_call_operand.hbm [shape: f32[2,4,256], index: 0, kind: input, shape index: {}]   ;;  %s806_s1 = inlined_call_operand.vmem [shape: f32[4,1], index: 1, kind: input, shape index: {}]   ;;  %s807_s2 = inlined_call_operand.vmem [shape: f32[4,1], index: 2, kind: input, shape index: {}]   ;;  %s808_s3 = inlined_call_operand.hbm [shape: f32[2,4,256], index: 3, kind: output, shape index: {}]  }
   0x1   :  { %10 = vsyncpa [#allocation3 + $0x1], 0 }
   0x2   :  { %11 = vsyncpa [#allocation4], 0 }
   0x3   :  { %13 = vsyncpa [#allocation4 + $0x1], 0  ;;  %s623_s12 = smov 0   ;;  %s625_s13 = smov 0  }
   0x4   :  { %s627_s14 = smov 0   ;;  %s629_s15 = smov 0  }
   0x5   :  { %s631_s16 = smov 0   ;;  %s633_s17 = smov 0  }
   0x6 LB: > { %s398_s18 = sadd.s32 4294967295, %s597_s17   ;;  %s399_s19 = sadd.s32 4294967294, %s597_s17   ;;  %s597_s17 = sphi %s633_s17, %s19_s17   ;;  %s593_s16 = sphi %s631_s16, %s824_s16   ;;  %s589_s15 = sphi %s629_s15, %s823_s15   ;;  %s585_s14 = sphi %s627_s14, %s822_s14   ;;  %s581_s13 = sphi %s625_s13, %s821_s13   ;;  %s577_s12 = sphi %s623_s12, %s820_s12  }
   0x7   : > { %s31_s20 = sadd.s32 1, %s593_s16  ;;  %s40_s21 = sadd.s32 1, %s585_s14 }
   0x8   : > { %p33_p0 = scmp.ge.s32.totalorder %s31_s20, 2  ;;  %p47_p1 = scmp.ne.s32.totalorder %s585_s14, %s581_s13 }
   0x9   : > { %p48_p2 = scmp.eq.s32.totalorder %s597_s17, 0  ;;  %p53_p3 = scmp.ne.s32.totalorder %s581_s13, %s577_s12 }
   0xa   : > { %s826_s20 = smov (%p33_p0, %s31_s20), 0  ;;  %p54_p5 = scmp.eq.s32.totalorder %s398_s18, 0 }
   0xb   : > { %p664_p4 = por %p48_p2, %p47_p1  ;;  %s35_s23 = ssub.s32 %s593_s16, %s826_s20 }
   0xc   : > { %p121_p6 = scmp.eq.s32.totalorder %s398_s18, 1  ;;  %p38_p7 = scmp.eq.s32.totalorder %s35_s23, 0 }
   0xd   : > { %p670_p8 = por %p54_p5, %p53_p3  ;;  %p127_p10 = scmp.eq.s32.totalorder %s399_s19, 1 }
   0xe   : > { %p674_p9 = por %p121_p6, %p47_p1  ;;  %p427_p13 = scmp.lt.s32.totalorder %s597_s17, 2 }
   0xf   : > { %s679_s26 = scalar_select %p38_p7, %s585_s14, %s40_s21  }
  0x10   : > { %s812_s25 = scalar_select %p674_p9, 1, 0 }
  0x11   : > { %p681_p11 = por %p127_p10, %p53_p3  ;;  %s153_s28 = sand.u32 1, %s585_s14  }
  0x12   : > { %s402_s29 = sshll.u32 %s153_s28, 3  ;;  %s413_s30 = sshll.u32 %s593_s16, 7 }
  0x13   : > { %s813_s27 = scalar_select %p681_p11, 1, 0 }
  0x14   : > { %s692_s6 = scalar_lea.hbm %s805_s0, %s413_s30  ;;  %s157_s7 = scalar_lea.vmem [#allocation2], %s402_s29 }
  0x15   : > { %s167_s8 = sshll.u32 %s157_s7, 4  ;;  %p698_p0 = pnand %p427_p13, %p664_p4  ;;  %s694_s8 = int_to_ptr.vmem [resolvable:$true] %s167_s8 }
  0x16   : > { %s154_s10 = scalar_lea.sflag [#allocation3], %s153_s28  ;;  %s485_s11 = scalar_lea.hbm %s692_s6, 128 }
  0x17   : > { %p486_p3 = scmp.ne.s32.totalorder %s692_s6, %s485_s11  ;;  %p487_p5 = pneg %p698_p0 }
  0x18   : > { %s490_s21 = scalar_lea.hbm %s805_s0, 256  ;;  %p491_p4 = scmp.lt.u32.totalorder %s692_s6, %s805_s0 }
  0x19   : > { %p488_p6 = pnand %p487_p5, %p486_p3  ;;  %p492_p10 = scmp.lt.u32.totalorder %s490_s21, %s485_s11 }
  0x1a   : > { %p494_p12 = scmp.lt.u32.totalorder %s485_s11, %s692_s6 }
  0x1b   : > { %p489_p7 = pneg %p488_p6  ;;  %p493_p13 = por %p492_p10, %p491_p4 }
  0x1d   : > { %p495_p1 = por %p494_p12, %p493_p13 }
  0x1f   : > { %p496_p2 = pnand %p495_p1, %p489_p7 }
  0x21   : > { %499 = shalt.err (!%p496_p2)
}
  0x22   : > { %s500_s28 = scalar_lea.vmem %s694_s8, 128  ;;  %s599_s29 = smov [#allocation2]  }
  0x23   : > { %p501_p3 = scmp.ne.s32.totalorder %s694_s8, %s500_s28  ;;  %s505_s30 = sshll.u32 %s599_s29, 4  ;;  %s506_s30 = int_to_ptr.vmem [resolvable:$false] %s505_s30 }
  0x24   : > { %s507_s4 = scalar_lea.vmem %s506_s30, 256  ;;  %p508_p9 = scmp.lt.s32.totalorder %s694_s8, %s506_s30 }
  0x25   : > { %p503_p6 = pnand %p501_p3, %p487_p5  ;;  %p509_p4 = scmp.lt.s32.totalorder %s507_s4, %s500_s28 }
  0x27   : > { %p504_p11 = pneg %p503_p6  ;;  %p510_p10 = por %p509_p4, %p508_p9 }
  0x29   : > { %p511_p12 = pnand %p510_p10, %p504_p11 }
  0x2b   : > { %514 = shalt.err (!%p511_p12)
}
  0x2c   : > { %422 = dma.hbm_to_vmem [thread:$0]  (!%p698_p0), %s692_s6, 128, %s694_s8, %s154_s10  }
  0x2d   : > { %p815_p1 = scmp.lt.s32.totalorder %s597_s17, 3  ;;  %p816_p2 = scmp.ge.s32.totalorder %s597_s17, 1 }
  0x2f   : > { %p173_p5 = pnand %p816_p2, %p815_p1 }
  0x30   : > { %s734_s5 = sand.u32 (!%p173_p5), 1, %s581_s13  }
  0x31   : > { %176 = sbr.rel (%p173_p5) target bundleno = 209 (0xd1), region = 32  ;;  %s406_s7 = sshll.u32 (!%p173_p5), %s734_s5, 3 }
  0x32   : > { %s179_s11 = scalar_lea.sflag (!%p173_p5), [#allocation3], %s734_s5  ;;  %s182_s9 = scalar_lea.vmem (!%p173_p5), [#allocation2], %s406_s7 }
  0x38   : > { %568 = dma.done.wait (%p670_p8), %s179_s11, 128  }
  0x39   : > { %570 = vsyncadd (%p670_p8), %s179_s11, 4294967168  ;;  %v600_v0 = vmov 0   ;;  %v258_v1 = vld [vmem:[%s806_s1] sm:$0xf]  ;;  %vm211_vm0 = vcmask 1043456   ;;  %v277_v49 = vlaneseq  ;;  %s414_s24 = sshll.u32 %s589_s15, 7 }
  0x3a   : > { %479 = vset.pattern.permute.xlu0 %v600_v0  ;;  %v259_v2 = vld [vmem:[%s807_s2] sm:$0xf]  ;;  %v601_v47 = vmov 839922192   ;;  %s204_s19 = scalar_lea.vmem [#allocation5], %s406_s7  ;;  %s756_s28 = scalar_lea.hbm %s808_s3, %s414_s24 }
  0x3b   : > { %272 = vperm.xlu0 %479, %v258_v1   ;;  %v207_v3 = vld [vmem:[%s182_s9] sm:$0xff]  ;;  %v275_v48 = vunpack.c.l.s4 %v601_v47  ;;  %v278_v52 = vshrl.u32 %v277_v49, 7  ;;  %s314_s21 = sshll.u32 %s204_s19, 4  ;;  %s298_s29 = scalar_lea.sflag [#allocation4], %s734_s5  ;;  %s758_s21 = int_to_ptr.vmem [resolvable:$true] %s314_s21 }
  0x3c   : > { %v209_v4 = vcombine.high %v207_v3, %v207_v3  ;;  %v228_v5 = vmul.f32 %v207_v3, %v207_v3  ;;  %v212_v6 = vsel %vm211_vm0, %v207_v3, 0.0  ;;  %s515_s30 = scalar_lea.vmem %s758_s21, 128  ;;  %p817_p9 = scmp.ne.s32.totalorder %s812_s25, 0 }
  0x3d   : > { %v213_v9 = vrot.slane %v212_v6, 4  ;;  %v276_v51 = vunpack.c.0.s8 %v275_v48  ;;  %p516_p8 = scmp.ne.s32.totalorder %s758_s21, %s515_s30  ;;  %s602_s15 = smov [#allocation5]  }
  0x3e   : > { %v219_v7 = vsel %vm211_vm0, %v209_v4, 0.0  ;;  %v230_v8 = vcombine.high %v228_v5, %v228_v5  ;;  %v232_v11 = vsel %vm211_vm0, %v228_v5, 0.0  ;;  %s519_s4 = sshll.u32 %s602_s15, 4  ;;  %s520_s4 = int_to_ptr.vmem [resolvable:$false] %s519_s4 }
  0x3f   : > { %285 = vperm.xlu0 %479, %v259_v2   ;;  %v220_v10 = vrot.slane %v219_v7, 4  ;;  %v214_v13 = vadd.f32 %v213_v9, %v212_v6  ;;  %v233_v14 = vrot.slane %v232_v11, 4  ;;  %v279_v55 = vsub.s32 %v276_v51, %v278_v52  ;;  %p517_p11 = pnand %p516_p8, %p817_p9  ;;  %s521_s7 = scalar_lea.vmem %s520_s4, 256 }
  0x40   : > { %v239_v12 = vsel %vm211_vm0, %v230_v8, 0.0  ;;  %p522_p7 = scmp.lt.s32.totalorder %s758_s21, %s520_s4  ;;  %p523_p13 = scmp.lt.s32.totalorder %s521_s7, %s515_s30 }
  0x41   : > { %v221_v15 = vadd.f32 %v220_v10, %v219_v7  ;;  %v240_v16 = vrot.slane %v239_v12, 4  ;;  %v215_v17 = vrot.slane %v214_v13, 2  ;;  %v234_v18 = vadd.f32 %v233_v14, %v232_v11  ;;  %p518_p0 = pneg %p517_p11 }
  0x42   : > { %p524_p3 = por %p523_p13, %p522_p7 }
  0x43   : > { %v222_v19 = vrot.slane %v221_v15, 2  ;;  %v241_v20 = vadd.f32 %v240_v16, %v239_v12  ;;  %v216_v21 = vadd.f32 %v215_v17, %v214_v13  ;;  %v235_v22 = vrot.slane %v234_v18, 2 }
  0x44   : > { %p525_p6 = pnand %p524_p3, %p518_p0 }
  0x45   : > { %v223_v23 = vadd.f32 %v222_v19, %v221_v15  ;;  %v242_v24 = vrot.slane %v241_v20, 2  ;;  %v217_v25 = vrot.slane %v216_v21, 1  ;;  %v236_v26 = vadd.f32 %v235_v22, %v234_v18 }
  0x47   : > { %v224_v27 = vrot.slane %v223_v23, 1  ;;  %v243_v28 = vadd.f32 %v242_v24, %v241_v20  ;;  %v218_v29 = vadd.f32 %v217_v25, %v216_v21  ;;  %v237_v30 = vrot.slane %v236_v26, 1 }
  0x49   : > { %v225_v31 = vadd.f32 %v224_v27, %v223_v23  ;;  %v244_v32 = vrot.slane %v243_v28, 1  ;;  %v226_v33 = vmul.f32 0.25, %v218_v29  ;;  %v238_v34 = vadd.f32 %v237_v30, %v236_v26 }
  0x4b   : > { %v227_v35 = vmul.f32 0.25, %v225_v31  ;;  %v245_v36 = vadd.f32 %v244_v32, %v243_v28  ;;  %v246_v37 = vmul.f32 0.25, %v238_v34  ;;  %v248_v38 = vmul.f32 %v226_v33, %v226_v33 }
  0x4d   : > { %v247_v39 = vmul.f32 0.25, %v245_v36  ;;  %v249_v40 = vmul.f32 %v227_v35, %v227_v35  ;;  %v250_v41 = vsub.f32 %v246_v37, %v248_v38  ;;  %v262_v53 = vcombine.low %v226_v33, %v227_v35 }
  0x4f   : > { %v251_v42 = vsub.f32 %v247_v39, %v249_v40  ;;  %v252_v43 = vmax.f32 %v250_v41, 0.0  ;;  %v264_v56 = vsub.f32 %v207_v3, %v262_v53 }
  0x51   : > { %v253_v44 = vmax.f32 %v251_v42, 0.0  ;;  %v254_v45 = vadd.f32 1e-06, %v252_v43 }
  0x53   : > { %v255_v46 = vadd.f32 1e-06, %v253_v44  ;;  %481 = vrsqrt.f32 %v254_v45 }
  0x55   : > { %483 = vrsqrt.f32 %v255_v46 }
  0x5d   : > { %v482_v50 = vpop.eup %481 }
  0x5f   : > { %v484_v54 = vpop.eup %483 }
  0x60   : > { %v267_v57 = vcombine.low %v482_v50, %v484_v54 }
  0x62   : > { %v269_v59 = vmul.f32 %v267_v57, %v264_v56 }
  0xba   : > { %v273_v58 = vpop.permute.xlu0 %272 }
  0xbb   : > { %v280_v60 = vrot.slane %v273_v58, %v279_v55 }
  0xbd   : > { %v282_v62 = vmul.f32 %v280_v60, %v269_v59 }
  0xbe   : > { %v286_v61 = vpop.permute.xlu0 %285 }
  0xbf   : > { %v293_v63 = vrot.slane %v286_v61, %v279_v55 }
  0xc1   : > { %v295_v0 = vadd.f32 %v293_v63, %v282_v62 }
  0xc3   : > { %296 = vst [vmem:[%s204_s19] sm:$0xff] %v295_v0 }
  0xc4   : > { %528 = shalt.err (!%p525_p6)
}
  0xc5   : > { %s529_s5 = scalar_lea.hbm %s756_s28, 128  ;;  %s533_s6 = scalar_lea.hbm %s808_s3, 256 }
  0xc6   : > { %p530_p4 = scmp.ne.s32.totalorder %s756_s28, %s529_s5  ;;  %p534_p1 = scmp.lt.u32.totalorder %s756_s28, %s808_s3 }
  0xc7   : > { %p535_p2 = scmp.lt.u32.totalorder %s533_s6, %s529_s5  ;;  %p537_p8 = scmp.lt.u32.totalorder %s529_s5, %s756_s28 }
  0xc8   : > { %p531_p10 = pnand %p530_p4, %p817_p9 }
  0xc9   : > { %p536_p5 = por %p535_p2, %p534_p1 }
  0xca   : > { %p532_p12 = pneg %p531_p10 }
  0xcb   : > { %p538_p11 = por %p537_p8, %p536_p5 }
  0xcd   : > { %p539_p0 = pnand %p538_p11, %p532_p12 }
  0xcf   : > { %542 = shalt.err (!%p539_p0)
}
  0xd0   : > { %417 = dma.vmem_to_hbm [thread:$0]  (%p817_p9), %s758_s21, 128, %s756_s28, %s298_s29  }
  0xd1 PF: > { %s326_s18 = sand.u32 1, %s577_s12   ;;  %p818_p7 = scmp.ne.s32.totalorder %s813_s27, 0 }
  0xd2   : > { %p819_p13 = scmp.ge.s32.totalorder %s597_s17, 2  ;;  %s327_s24 = scalar_lea.sflag [#allocation4], %s326_s18 }
  0xd4   : > { %p424_p3 = pnand %p819_p13, %p818_p7 }
  0xd6   : > { %572 = dma.done.wait (!%p424_p3), %s327_s24, 128  }
  0xd7   : > { %574 = vsyncadd (!%p424_p3), %s327_s24, 4294967168  ;;  %s19_s17 = sadd.s32 1, %s597_s17   ;;  %s820_s12 = smov %s581_s13 }
  0xd8   : > { %p16_p6 = scmp.ge.s32.totalorder %s19_s17, 4   ;;  %s821_s13 = smov %s585_s14 }
  0xd9   : > { %s822_s14 = smov %s679_s26  ;;  %s823_s15 = smov %s593_s16 }
  0xda   : > { %s824_s16 = smov %s826_s20  ;;  %18 = sbr.rel (!%p16_p6) target bundleno = 6 (0x6), region = 77 }
  0xe1   :  { %332 = vsyncpa [#allocation3], 1 }
  0xe2   :  { %334 = vsyncpa [#allocation3 + $0x1], 1 }
  0xe3   :  { %335 = vsyncpa [#allocation4], 1 }
  0xe4   :  { %337 = vsyncpa [#allocation4 + $0x1], 1 }

</bundles_post_ra>
